<compile_context>
chip_gen: v6e
topology: v6e:2x2x1
jax: 0.10.0
libtpu: 0.0.40
codegen_flags: <defaults>
</compile_context>

<pallas_src>
import jax
import jax.numpy as jnp
from jax.experimental import pallas as pl
from jax.experimental.pallas import tpu as pltpu

LANE = 128
TILE_ROWS = 512  # (512, 128) f32 block = 256 KiB; 2 inputs x 2 buffers = 1 MiB VMEM


def _make_partial_sq_kernel(tile_rows: int, rows: int, ragged: bool):
    """Per-block sum of squared differences, reduced to an (8, 128) partial."""

    def kernel(p_ref, t_ref, o_ref):
        # Cast after the load so narrower inputs stream at native width.
        d = p_ref[...].astype(jnp.float32) - t_ref[...].astype(jnp.float32)

        if ragged:  # static: only emitted when the grid does not divide rows
            i = pl.program_id(0)
            gr = i * tile_rows + jax.lax.broadcasted_iota(jnp.int32, d.shape, 0)
            d = jnp.where(gr < rows, d, 0.0)

        sq = d * d  # (tile_rows, LANE)

        if tile_rows % 8 == 0:
            # Fold sublane-tiles onto one vreg: pure VPU adds, no cross-lane work.
            o_ref[...] = sq.reshape(tile_rows // 8, 8, LANE).sum(axis=0)
        else:
            # Tiny single-block case (rows < TILE_ROWS and not a multiple of 8).
            colsum = jnp.sum(sq, axis=0, keepdims=True)              # (1, LANE)
            ridx = jax.lax.broadcasted_iota(jnp.int32, (8, LANE), 0)
            o_ref[...] = jnp.where(ridx == 0, colsum, 0.0)

    return kernel


def mse_loss_wrapper(preds, targets, log_w):
    """Pallas equivalent of MSELossWrapper(nn.MSELoss()).forward.

    preds/targets: identical shapes, float (f32 or narrower). log_w: shape (1,).
    Returns the loss with shape (1,), float32 (matches torch broadcasting).
    """
    assert preds.shape == targets.shape
    n = int(preds.size)

    flat_p = preds.reshape(-1)
    flat_t = targets.reshape(-1)

    # Pad (both with zeros -> zero diff) only when n is not a multiple of the
    # lane width; at most 127 elements.  For the common case this branch is dead
    # and no extra HBM copy is materialized.
    rem = n % LANE
    if rem:
        pad = LANE - rem
        flat_p = jnp.pad(flat_p, (0, pad))
        flat_t = jnp.pad(flat_t, (0, pad))

    rows = flat_p.shape[0] // LANE
    tile_rows = min(TILE_ROWS, rows)          # small inputs: one full-array block
    num_blocks = pl.cdiv(rows, tile_rows)
    ragged = (rows % tile_rows) != 0          # only possible when rows > TILE_ROWS

    p2 = flat_p.reshape(rows, LANE)
    t2 = flat_t.reshape(rows, LANE)

    partials = pl.pallas_call(
        _make_partial_sq_kernel(tile_rows, rows, ragged),
        out_shape=jax.ShapeDtypeStruct((8, num_blocks * LANE), jnp.float32),
        grid_spec=pltpu.PrefetchScalarGridSpec(
            num_scalar_prefetch=0,
            grid=(num_blocks,),
            in_specs=[
                pl.BlockSpec((tile_rows, LANE), lambda i: (i, 0)),   # preds
                pl.BlockSpec((tile_rows, LANE), lambda i: (i, 0)),   # targets
            ],
            out_specs=pl.BlockSpec((8, LANE), lambda i: (0, i)),     # partial sums
        ),
        compiler_params=pltpu.CompilerParams(
            dimension_semantics=("parallel",),   # lets v7x shard across both TCs
        ),
    )(p2, t2)

    # Trivial scalar epilogue (plain JAX, as recommended): mean + uncertainty weight.
    total = jnp.sum(partials)
    mse = total / n
    log_w = log_w.astype(jnp.float32).reshape(1)
    loss = 0.5 * jnp.exp(-log_w) * mse + 0.5 * log_w
    return loss


if __name__ == "__main__":
    key = jax.random.PRNGKey(0)
    k1, k2 = jax.random.split(key)

    # NCHW-like example inputs (batch=2, channels=4, spatial=16x16)
    preds = jax.random.normal(k1, (2, 4, 16, 16), dtype=jnp.float32)
    targets = jax.random.normal(k2, (2, 4, 16, 16), dtype=jnp.float32)

    # nn.Parameter(torch.zeros(1)) — deterministic init
    log_w = jnp.zeros((1,), dtype=jnp.float32)

    loss = mse_loss_wrapper(preds, targets, log_w)
    jax.block_until_ready(loss)

    # reference check in plain JAX
    ref = 0.5 * jnp.exp(-log_w) * jnp.mean((preds - targets) ** 2) + 0.5 * log_w
    assert loss.shape == (1,)
    assert jnp.allclose(loss, ref, rtol=1e-5, atol=1e-6), (loss, ref)

    print("KERNEL_OK")
</pallas_src>

<mosaic_0001>
module attributes {stable_mosaic.version = 11 : i64} {
  func.func @kernel(%arg0: i32, %arg1: memref<16x128xf32, #tpu.memory_space<vmem>>, %arg2: memref<16x128xf32, #tpu.memory_space<vmem>>, %arg3: memref<8x128xf32, #tpu.memory_space<vmem>>) attributes {dimension_semantics = [#tpu.dimension_semantics<parallel>], iteration_bounds = array<i64: 1>, scalar_prefetch = 0 : i64, scratch_operands = 0 : i64, tpu.core_type = #tpu.core_type<tc>, window_params = [{transform_indices = @transform_0, window_bounds = array<i64: 16, 128>}, {transform_indices = @transform_1, window_bounds = array<i64: 16, 128>}, {transform_indices = @transform_2, window_bounds = array<i64: 8, 128>}]} {
    %c0 = arith.constant 0 : index
    %c0_0 = arith.constant 0 : index
    %0 = vector.load %arg1[%c0, %c0_0] : memref<16x128xf32, #tpu.memory_space<vmem>>, vector<16x128xf32>
    %c0_1 = arith.constant 0 : index
    %c0_2 = arith.constant 0 : index
    %1 = vector.load %arg2[%c0_1, %c0_2] : memref<16x128xf32, #tpu.memory_space<vmem>>, vector<16x128xf32>
    %2 = arith.subf %0, %1 : vector<16x128xf32>
    %3 = arith.mulf %2, %2 : vector<16x128xf32>
    %4 = vector.shape_cast %3 : vector<16x128xf32> to vector<2x8x128xf32>
    %cst = arith.constant dense<0.000000e+00> : vector<8x128xf32>
    %5 = vector.multi_reduction <add>, %4, %cst [0] : vector<2x8x128xf32> to vector<8x128xf32>
    %c0_3 = arith.constant 0 : index
    %c0_4 = arith.constant 0 : index
    %6 = vector.load %arg3[%c0_3, %c0_4] : memref<8x128xf32, #tpu.memory_space<vmem>>, vector<8x128xf32>
    tpu.vector_store %arg3[%c0_3, %c0_4], %5 {strides = array<i32>} : memref<8x128xf32, #tpu.memory_space<vmem>>, vector<8x128xf32>,
    return
  }
  func.func @transform_0(%arg0: i32) -> (i32, i32) {
    %c0_i32 = arith.constant 0 : i32
    %c0_i32_0 = arith.constant 0 : i32
    return %arg0, %c0_i32 : i32, i32
  }
  func.func @transform_1(%arg0: i32) -> (i32, i32) {
    %c0_i32 = arith.constant 0 : i32
    %c0_i32_0 = arith.constant 0 : i32
    return %arg0, %c0_i32 : i32, i32
  }
  func.func @transform_2(%arg0: i32) -> (i32, i32) {
    %c0_i32 = arith.constant 0 : i32
    %c0_i32_0 = arith.constant 0 : i32
    return %c0_i32, %arg0 : i32, i32
  }
}

</mosaic_0001>

<bundles_post_ra>
// kernel: tpu_custom_call.1
= control target key start
LH: loop header
LB: loop body
LE: loop exit
PB: predicated region body
PF: predicated region fallthrough
CT: control target
= control target key end

     0   :  { %7 = vsyncpa [#allocation3], 0  ;;  %s166_s0 = inlined_call_operand.hbm [shape: f32[16,128], index: 0, kind: input, shape index: {}]   ;;  %s167_s1 = inlined_call_operand.hbm [shape: f32[16,128], index: 1, kind: input, shape index: {}]   ;;  %s168_s2 = inlined_call_operand.hbm [shape: f32[8,128], index: 2, kind: output, shape index: {}]  }
   0x1   :  { %8 = vsyncpa [#allocation6], 0 }
   0x2   :  { %9 = vsyncpa [#allocation4], 0  ;;  %s137_s9 = smov [#allocation2]  }
   0x3   :  { %s15_s10 = sshll.u32 %s137_s9, 4  ;;  %s16_s10 = int_to_ptr.vmem [resolvable:$true] %s15_s10 }
   0x4   :  { %s79_s11 = scalar_lea.vmem %s16_s10, 256  ;;  %p84_p1 = scmp.lt.s32.totalorder %s16_s10, %s16_s10 }
   0x5   :  { %p80_p0 = scmp.ne.s32.totalorder %s16_s10, %s79_s11  ;;  %p85_p2 = scmp.lt.s32.totalorder %s79_s11, %s79_s11 }
   0x7   :  { %p86_p3 = por %p85_p2, %p84_p1 }
   0x9   :  { %p87_p4 = pnand %p86_p3, %p80_p0 }
   0xb   :  { %90 = shalt.err (!%p87_p4)
}
   0xc   :  { %s138_s12 = smov 128   ;;  %s139_s13 = smov 8  }
   0xd   :  { %21 = dma.hbm_to_vmem [thread:$0]  %s166_s0, 256, %s16_s10, [#allocation3], %s138_s12, %s138_s12, %s139_s13  }
   0xe   :  { %s140_s16 = smov [#allocation5]  }
   0xf   :  { %s27_s17 = sshll.u32 %s140_s16, 4  ;;  %s28_s17 = int_to_ptr.vmem [resolvable:$true] %s27_s17 }
  0x10   :  { %s99_s18 = scalar_lea.vmem %s28_s17, 256  ;;  %p104_p6 = scmp.lt.s32.totalorder %s28_s17, %s28_s17 }
  0x11   :  { %p100_p5 = scmp.ne.s32.totalorder %s28_s17, %s99_s18  ;;  %p105_p7 = scmp.lt.s32.totalorder %s99_s18, %s99_s18 }
  0x13   :  { %p106_p8 = por %p105_p7, %p104_p6 }
  0x15   :  { %p107_p9 = pnand %p106_p8, %p100_p5 }
  0x17   :  { %110 = shalt.err (!%p107_p9)
}
  0x18   :  { %33 = dma.hbm_to_vmem [thread:$0]  %s167_s1, 256, %s28_s17, [#allocation6], %s138_s12, %s138_s12, %s139_s13  }
  0x19   :  { %131 = dma.done.wait [#allocation3], 256  }
  0x1a   :  { %132 = vsyncadd [#allocation3], 4294967040 }
  0x1b   :  { %133 = dma.done.wait [#allocation6], 256  }
  0x1c   :  { %134 = vsyncadd [#allocation6], 4294967040  ;;  %v40_v0 = vld [vmem:[#allocation2] sm:$0xff]  ;;  %v41_v1 = vld [vmem:[#allocation2 + $0x8] sm:$0xff]  ;;  %s141_s0 = smov [#allocation7]  }
  0x1d   :  { %v42_v2 = vld [vmem:[#allocation5] sm:$0xff]  ;;  %v43_v3 = vld [vmem:[#allocation5 + $0x8] sm:$0xff]  ;;  %s56_s21 = sshll.u32 %s141_s0, 4  ;;  %s57_s21 = int_to_ptr.vmem [resolvable:$true] %s56_s21 }
  0x1e   :  { %v44_v4 = vsub.f32 %v40_v0, %v42_v2  ;;  %v45_v5 = vsub.f32 %v41_v1, %v43_v3  ;;  %s111_s22 = scalar_lea.vmem %s57_s21, 128  ;;  %p116_p11 = scmp.lt.s32.totalorder %s57_s21, %s57_s21 }
  0x1f   :  { %p112_p10 = scmp.ne.s32.totalorder %s57_s21, %s111_s22  ;;  %p117_p12 = scmp.lt.s32.totalorder %s111_s22, %s111_s22 }
  0x20   :  { %v46_v6 = vmul.f32 %v44_v4, %v44_v4  ;;  %v47_v7 = vmul.f32 %v45_v5, %v45_v5 }
  0x21   :  { %p118_p13 = por %p117_p12, %p116_p11 }
  0x22   :  { %v48_v8 = vadd.f32 %v47_v7, %v46_v6 }
  0x23   :  { %p119_p0 = pnand %p118_p13, %p112_p10 }
  0x24   :  { %49 = vst [vmem:[#allocation7] sm:$0xff] %v48_v8 }
  0x25   :  { %122 = shalt.err (!%p119_p0)
}
  0x26   :  { %59 = dma.vmem_to_hbm [thread:$0]  %s57_s21, 128, %s168_s2, [#allocation4]  }
  0x27   :  { %135 = dma.done.wait [#allocation4], 128  }
  0x28   :  { %136 = vsyncadd [#allocation4], 4294967168 }
  0x29   :  { %63 = vsyncpa [#allocation3], 1 }
  0x2a   :  { %64 = vsyncpa [#allocation6], 1 }
  0x2b   :  { %65 = vsyncpa [#allocation4], 1 }

</bundles_post_ra>
